<compile_context>
chip_gen: v5e
topology: v5e:2x2
jax: 0.10.0
libtpu: 0.0.40
codegen_flags: <defaults>
</compile_context>

<pallas_src>
import functools

import jax
import jax.numpy as jnp
from jax.experimental import pallas as pl
from jax.experimental.pallas import tpu as pltpu


def _round_up(x: int, m: int) -> int:
    return ((x + m - 1) // m) * m


def _prenorm_linear_kernel(x_ref, w_ref, b_ref, o_ref, xn_ref, *, eps: float):
    # x_ref : (TR, D)   rows of the flattened input
    # w_ref : (D, TN)   bf16 weight tile (LayerNorm gamma pre-folded)
    # b_ref : (1, TN)   f32 fused bias tile (beta @ W + b pre-folded)
    # o_ref : (TR, TN)  output tile (lane-dense, TN multiple of 128)
    # xn_ref: (TR, D)   bf16 scratch holding the normalized rows

    # LayerNorm runs only once per row tile (first H step) and is reused for
    # every subsequent H tile of the same rows.
    @pl.when(pl.program_id(1) == 0)
    def _():
        x = x_ref[...].astype(jnp.float32)
        # One-pass statistics (biased variance, matches nn.LayerNorm).
        mean = jnp.mean(x, axis=-1, keepdims=True)
        mean_sq = jnp.mean(x * x, axis=-1, keepdims=True)
        var = mean_sq - mean * mean
        xn_ref[...] = ((x - mean) * jax.lax.rsqrt(var + eps)).astype(xn_ref.dtype)

    # fn = Linear(dim -> hidden): bf16 operands, f32 accumulation on the MXU.
    y = jnp.dot(xn_ref[...], w_ref[...], preferred_element_type=jnp.float32)
    o_ref[...] = (y + b_ref[...]).astype(o_ref.dtype)


def fold_prenorm_linear_params(gamma, beta, w, b):
    """Fold the LayerNorm affine into the Linear layer (do this ONCE for static
    weights; it is a full D*H read+write and should not run per forward call).

      (xn * gamma + beta) @ W + b == xn @ (gamma[:, None] * W) + (beta @ W + b)
    """
    w32 = w.astype(jnp.float32)
    w_eff = (gamma.astype(jnp.float32)[:, None] * w32).astype(jnp.bfloat16)
    b_eff = (beta.astype(jnp.float32) @ w32 + b.astype(jnp.float32)).reshape(1, -1)
    return w_eff, b_eff


def _vmem_estimate(tr, tn, d, in_bytes, out_bytes):
    """Rough VMEM bytes: double-buffered I/O tiles + scratch + f32 LN temps."""
    return (2 * tr * d * in_bytes      # x tile
            + 2 * d * tn * 2           # bf16 W tile
            + 2 * tn * 4               # fused bias tile
            + 2 * tr * tn * out_bytes  # output tile
            + tr * d * 2               # bf16 xn scratch
            + 3 * tr * d * 4)          # in-kernel f32 LN temporaries


def prenorm_linear_folded(x, w_eff, b_eff, *, eps: float = 1e-5,
                          tile_rows: int = 512, tile_n: int | None = None,
                          out_dtype=None,
                          vmem_budget_bytes: int = 32 * 1024 * 1024):
    """PreNorm(dim, Linear(dim, hidden)) forward with pre-folded params.

    x: (B, S, D); w_eff: (D, H) bf16; b_eff: (1, H) f32. Returns (B, S, H).
    tile_n=None lets the wrapper keep the whole weight resident when it fits.
    """
    B, S, D = x.shape
    H = w_eff.shape[1]
    rows = B * S
    out_dtype = x.dtype if out_dtype is None else jnp.dtype(out_dtype)
    in_bytes = x.dtype.itemsize
    out_bytes = jnp.dtype(out_dtype).itemsize

    h128 = _round_up(H, 128)

    def fits(tr_, tn_):
        return _vmem_estimate(tr_, tn_, D, in_bytes, out_bytes) <= vmem_budget_bytes

    tr0 = _round_up(min(tile_rows, _round_up(rows, 8)), 8)

    if tile_n is None:
        # Preferred path: whole (padded) H as a single lane-dense tile -> the H
        # grid axis collapses, W stays resident, LN runs once per row tile.
        tr, tn = tr0, h128
        while tr > 8 and not fits(tr, tn):
            tr = _round_up(tr // 2, 8)
        if not fits(tr, tn):
            # Weight too big for VMEM: tile H (multiple of 256 fills both MXUs).
            tr, tn = tr0, min(512, h128)
    else:
        tr, tn = tr0, _round_up(min(tile_n, h128), 128)

    # Safety shrink for the tiled-H path / very large D (v7x: 64 MiB per TC).
    while tn > 128 and not fits(tr, tn):
        tn = max(128, _round_up(tn // 2, 128))
    while tr > 8 and not fits(tr, tn):
        tr = _round_up(tr // 2, 8)

    h_p = _round_up(H, tn)
    if h_p != H:  # cheap: pads only the (small) weight/bias along H
        w_eff = jnp.pad(w_eff, ((0, 0), (0, h_p - H)))
        b_eff = jnp.pad(b_eff, ((0, 0), (0, h_p - H)))

    x2 = x.reshape(rows, D)  # no row padding: ragged last tile is masked

    grid = (pl.cdiv(rows, tr), h_p // tn)

    est = _vmem_estimate(tr, tn, D, in_bytes, out_bytes)
    vmem_limit = int(min(64 * 1024 * 1024, max(40 * 1024 * 1024, est + (4 << 20))))

    out = pl.pallas_call(
        functools.partial(_prenorm_linear_kernel, eps=eps),
        out_shape=jax.ShapeDtypeStruct((rows, h_p), out_dtype),
        grid_spec=pltpu.PrefetchScalarGridSpec(
            num_scalar_prefetch=0,
            grid=grid,
            in_specs=[
                pl.BlockSpec((tr, D), lambda i, j: (i, 0)),   # x row tile
                pl.BlockSpec((D, tn), lambda i, j: (0, j)),   # bf16 W tile
                pl.BlockSpec((1, tn), lambda i, j: (0, j)),   # fused bias tile
            ],
            out_specs=pl.BlockSpec((tr, tn), lambda i, j: (i, j)),
            scratch_shapes=[pltpu.VMEM((tr, D), jnp.bfloat16)],  # normalized rows
        ),
        compiler_params=pltpu.CompilerParams(
            # Row axis parallel (v7x megacore shards disjoint row tiles), H axis
            # arbitrary so the LN scratch carry across j is valid.
            dimension_semantics=("parallel", "arbitrary"),
            vmem_limit_bytes=vmem_limit),
    )(x2, w_eff, b_eff)

    return out[:, :H].reshape(B, S, H)


def prenorm_linear(x, gamma, beta, w, b, **kwargs):
    """Convenience wrapper: folds the LN affine every call. Prefer folding once
    with fold_prenorm_linear_params() when the weights are static."""
    w_eff, b_eff = fold_prenorm_linear_params(gamma, beta, w, b)
    return prenorm_linear_folded(x, w_eff, b_eff, **kwargs)


def prenorm_linear_ref(x, gamma, beta, w, b, eps=1e-5):
    xf = x.astype(jnp.float32)
    mean = jnp.mean(xf, axis=-1, keepdims=True)
    var = jnp.mean((xf - mean) ** 2, axis=-1, keepdims=True)
    xn = (xf - mean) * jax.lax.rsqrt(var + eps)
    xn = xn * gamma + beta
    return (xn @ w + b).astype(x.dtype)


if __name__ == "__main__":
    key = jax.random.PRNGKey(0)
    kx, kg, kb, kw, kbb, kx2 = jax.random.split(key, 6)

    # Small but lane-dense shapes: batch=2, seq=8, dim=128, hidden=256.
    B, S, D, H = 2, 8, 128, 256
    x = jax.random.normal(kx, (B, S, D), dtype=jnp.float32)

    # LayerNorm params (PyTorch init gamma=1, beta=0; perturbed so the affine
    # path is exercised) and fn = Linear(D, H) params.
    gamma = 1.0 + 0.1 * jax.random.normal(kg, (D,), dtype=jnp.float32)
    beta = 0.1 * jax.random.normal(kb, (D,), dtype=jnp.float32)
    w = jax.random.normal(kw, (D, H), dtype=jnp.float32) / jnp.sqrt(D)
    b = 0.01 * jax.random.normal(kbb, (H,), dtype=jnp.float32)

    # Fold the LN affine into (W, b) ONCE (static weights), not per forward.
    w_eff, b_eff = fold_prenorm_linear_params(gamma, beta, w, b)
    w_eff, b_eff = jax.block_until_ready((w_eff, b_eff))

    # Path 1: weight resident in VMEM, single H step, LN once per row tile.
    y = prenorm_linear_folded(x, w_eff, b_eff)
    y = jax.block_until_ready(y)
    y_ref = prenorm_linear_ref(x, gamma, beta, w, b)
    assert y.shape == (B, S, H)
    # bf16 MXU operands (f32 accumulation) => small deviation vs pure-f32 ref.
    assert jnp.allclose(y, y_ref, atol=2e-2, rtol=2e-2), "mismatch (resident-W path)"

    # Path 2 (forced): tiled H with the LN scratch hoist, plus a ragged
    # (non-divisible) last row tile with no activation padding.
    S2 = 9  # rows = 18, not a multiple of the row tile
    x2 = jax.random.normal(kx2, (B, S2, D), dtype=jnp.float32)
    y2 = prenorm_linear_folded(x2, w_eff, b_eff, tile_rows=8, tile_n=128)
    y2 = jax.block_until_ready(y2)
    y2_ref = prenorm_linear_ref(x2, gamma, beta, w, b)
    assert y2.shape == (B, S2, H)
    assert jnp.allclose(y2, y2_ref, atol=2e-2, rtol=2e-2), "mismatch (tiled-H path)"

    print("KERNEL_OK")
</pallas_src>

<mosaic_0001>
module attributes {stable_mosaic.version = 11 : i64} {
  func.func @_prenorm_linear_kernel(%arg0: i32, %arg1: i32, %arg2: memref<16x128xf32, #tpu.memory_space<vmem>>, %arg3: memref<128x256xbf16, #tpu.memory_space<vmem>>, %arg4: memref<1x256xf32, #tpu.memory_space<vmem>>, %arg5: memref<16x256xf32, #tpu.memory_space<vmem>>, %arg6: memref<16x128xbf16, #tpu.memory_space<vmem>>) attributes {dimension_semantics = [#tpu.dimension_semantics<parallel>, #tpu.dimension_semantics<arbitrary>], iteration_bounds = array<i64: 1, 1>, scalar_prefetch = 0 : i64, scratch_operands = 1 : i64, tpu.core_type = #tpu.core_type<tc>, window_params = [{transform_indices = @transform_0, window_bounds = array<i64: 16, 128>}, {transform_indices = @transform_1, window_bounds = array<i64: 128, 256>}, {transform_indices = @transform_2, window_bounds = array<i64: 1, 256>}, {transform_indices = @transform_3, window_bounds = array<i64: 16, 256>}]} {
    %c0_i32 = arith.constant 0 : i32
    %0 = arith.cmpi eq, %arg1, %c0_i32 : i32
    %1 = arith.extui %0 : i1 to i32
    %c0_i32_0 = arith.constant 0 : i32
    %2 = arith.cmpi ne, %1, %c0_i32_0 : i32
    scf.if %2 {
      %c0_8 = arith.constant 0 : index
      %c0_9 = arith.constant 0 : index
      %10 = vector.load %arg2[%c0_8, %c0_9] : memref<16x128xf32, #tpu.memory_space<vmem>>, vector<16x128xf32>
      %cst_10 = arith.constant dense<0.000000e+00> : vector<16xf32>
      %11 = vector.multi_reduction <add>, %10, %cst_10 [1] : vector<16x128xf32> to vector<16xf32>
      %12 = vector.shape_cast %11 : vector<16xf32> to vector<16x1xf32>
      %cst_11 = arith.constant 1.280000e+02 : f32
      %13 = vector.broadcast %cst_11 : f32 to vector<16x1xf32>
      %14 = arith.divf %12, %13 : vector<16x1xf32>
      %15 = arith.mulf %10, %10 : vector<16x128xf32>
      %cst_12 = arith.constant dense<0.000000e+00> : vector<16xf32>
      %16 = vector.multi_reduction <add>, %15, %cst_12 [1] : vector<16x128xf32> to vector<16xf32>
      %17 = vector.shape_cast %16 : vector<16xf32> to vector<16x1xf32>
      %cst_13 = arith.constant 1.280000e+02 : f32
      %18 = vector.broadcast %cst_13 : f32 to vector<16x1xf32>
      %19 = arith.divf %17, %18 : vector<16x1xf32>
      %20 = arith.mulf %14, %14 : vector<16x1xf32>
      %21 = arith.subf %19, %20 : vector<16x1xf32>
      %22 = vector.broadcast %14 : vector<16x1xf32> to vector<16x128xf32>
      %23 = arith.subf %10, %22 : vector<16x128xf32>
      %cst_14 = arith.constant 9.99999974E-6 : f32
      %24 = vector.broadcast %cst_14 : f32 to vector<16x1xf32>
      %25 = arith.addf %21, %24 : vector<16x1xf32>
      %26 = math.rsqrt %25 : vector<16x1xf32>
      %27 = vector.broadcast %26 : vector<16x1xf32> to vector<16x128xf32>
      %28 = arith.mulf %23, %27 : vector<16x128xf32>
      %29 = arith.truncf %28 : vector<16x128xf32> to vector<16x128xbf16>
      %c0_15 = arith.constant 0 : index
      %c0_16 = arith.constant 0 : index
      %30 = vector.load %arg6[%c0_15, %c0_16] : memref<16x128xbf16, #tpu.memory_space<vmem>>, vector<16x128xbf16>
      tpu.vector_store %arg6[%c0_15, %c0_16], %29 {strides = array<i32>} : memref<16x128xbf16, #tpu.memory_space<vmem>>, vector<16x128xbf16>,
    } else {
    }
    %c0 = arith.constant 0 : index
    %c0_1 = arith.constant 0 : index
    %3 = vector.load %arg6[%c0, %c0_1] : memref<16x128xbf16, #tpu.memory_space<vmem>>, vector<16x128xbf16>
    %c0_2 = arith.constant 0 : index
    %c0_3 = arith.constant 0 : index
    %4 = vector.load %arg3[%c0_2, %c0_3] : memref<128x256xbf16, #tpu.memory_space<vmem>>, vector<128x256xbf16>
    %cst = arith.constant dense<0.000000e+00> : vector<16x256xf32>
    %5 = tpu.matmul %3, %4, %cst {dimension_numbers = #tpu.dot_dimension_numbers<[1], [0], [0], [1], [0, 0, 1, 1], [], []>} : vector<16x128xbf16>, vector<128x256xbf16>, vector<16x256xf32> -> vector<16x256xf32>
    %c0_4 = arith.constant 0 : index
    %c0_5 = arith.constant 0 : index
    %6 = vector.load %arg4[%c0_4, %c0_5] : memref<1x256xf32, #tpu.memory_space<vmem>>, vector<1x256xf32>
    %7 = vector.broadcast %6 : vector<1x256xf32> to vector<16x256xf32>
    %8 = arith.addf %5, %7 : vector<16x256xf32>
    %c0_6 = arith.constant 0 : index
    %c0_7 = arith.constant 0 : index
    %9 = vector.load %arg5[%c0_6, %c0_7] : memref<16x256xf32, #tpu.memory_space<vmem>>, vector<16x256xf32>
    tpu.vector_store %arg5[%c0_6, %c0_7], %8 {strides = array<i32>} : memref<16x256xf32, #tpu.memory_space<vmem>>, vector<16x256xf32>,
    return
  }
  func.func @transform_0(%arg0: i32, %arg1: i32) -> (i32, i32) {
    %c0_i32 = arith.constant 0 : i32
    %c0_i32_0 = arith.constant 0 : i32
    return %arg0, %c0_i32 : i32, i32
  }
  func.func @transform_1(%arg0: i32, %arg1: i32) -> (i32, i32) {
    %c0_i32 = arith.constant 0 : i32
    %c0_i32_0 = arith.constant 0 : i32
    return %c0_i32, %arg1 : i32, i32
  }
  func.func @transform_2(%arg0: i32, %arg1: i32) -> (i32, i32) {
    %c0_i32 = arith.constant 0 : i32
    %c0_i32_0 = arith.constant 0 : i32
    return %c0_i32, %arg1 : i32, i32
  }
  func.func @transform_3(%arg0: i32, %arg1: i32) -> (i32, i32) {
    %c0_i32 = arith.constant 0 : i32
    return %arg0, %arg1 : i32, i32
  }
}

</mosaic_0001>

<bundles_post_ra>
// kernel: tpu_custom_call.1
= control target key start
LH: loop header
LB: loop body
LE: loop exit
PB: predicated region body
PF: predicated region fallthrough
CT: control target
= control target key end

     0   :  { %8 = vsyncpa [#allocation4], 0  ;;  %s548_s0 = inlined_call_operand.hbm [shape: f32[16,128], index: 0, kind: input, shape index: {}]   ;;  %s549_s1 = inlined_call_operand.hbm [shape: bf16[128,256], index: 1, kind: input, shape index: {}]   ;;  %s550_s2 = inlined_call_operand.hbm [shape: f32[1,256], index: 2, kind: input, shape index: {}]   ;;  %s551_s3 = inlined_call_operand.hbm [shape: f32[16,256], index: 3, kind: output, shape index: {}]  }
   0x1   :  { %9 = vsyncpa [#allocation7], 0 }
   0x2   :  { %10 = vsyncpa [#allocation5], 0  ;;  %s28_s14 = sshll.u32 %s549_s1, 4  ;;  %s490_s15 = smov [#allocation6]   ;;  %s29_s14 = int_to_ptr.hbm [resolvable:$true] %s28_s14 }
   0x3   :  { %s30_s16 = sshll.u32 %s490_s15, 4  ;;  %s15_s19 = sshll.u32 %s548_s0, 4  ;;  %s31_s16 = int_to_ptr.vmem [resolvable:$true] %s30_s16  ;;  %s16_s19 = int_to_ptr.hbm [resolvable:$true] %s15_s19 }
   0x4   :  { %s491_s20 = smov 128   ;;  %s492_s21 = smov 8  }
   0x5   :  { %36 = dma.hbm_to_vmem [thread:$0]  %s29_s14, 2048, %s31_s16, [#allocation7], %s491_s20, %s491_s20, %s492_s21  }
   0x6   :  { %s493_s22 = smov [#allocation3]   ;;  %s42_s26 = sshll.u32 %s550_s2, 4  ;;  %s43_s26 = int_to_ptr.hbm [resolvable:$true] %s42_s26 }
   0x7   :  { %s17_s23 = sshll.u32 %s493_s22, 4  ;;  %s494_s1 = smov [#allocation8]   ;;  %s18_s23 = int_to_ptr.vmem [resolvable:$true] %s17_s23 }
   0x8   :  { %23 = dma.hbm_to_vmem [thread:$0]  %s16_s19, 256, %s18_s23, [#allocation4], %s491_s20, %s491_s20, %s492_s21  }
   0x9   :  { %s44_s27 = sshll.u32 %s494_s1, 4  ;;  %s45_s27 = int_to_ptr.vmem [resolvable:$true] %s44_s27 }
   0xa   :  { %47 = dma.hbm_to_vmem [thread:$0]  %s43_s26, 32, %s45_s27, [#allocation7]  }
   0xb   :  { %484 = dma.done.wait [#allocation4], 256  }
   0xc   :  { %485 = vsyncadd [#allocation4], 4294967040 }
   0xd   :  { %486 = dma.done.wait [#allocation7], 2080  }
   0xe   :  { %487 = vsyncadd [#allocation7], 4294965216  ;;  %v528_v0 = vld [vmem:[#allocation3] sm:$0xff]  ;;  %v533_v2 = vld [vmem:[#allocation3 + $0x8] sm:$0xff]  ;;  %v495_v4 = vmov 128.0   ;;  %s496_s0 = smov [#allocation9]  }
   0xf   :  { %66 = vadd.xlane.f32.xlu0 %v528_v0  ;;  %v79_v1 = vmul.f32 %v528_v0, %v528_v0  ;;  %v80_v3 = vmul.f32 %v533_v2, %v533_v2  ;;  %382 = vrcp.f32 %v495_v4  ;;  %v345_v7 = vld [vmem:[#allocation6 + $0x70] sm:$0xf]  ;;  %v367_v8 = vld [vmem:[#allocation6 + $0x74] sm:$0xf0]  ;;  %v366_v9 = vld [vmem:[#allocation6 + $0x74] sm:$0xf] }
  0x10   :  { %v346_v10 = vor.u32 %v367_v8, %v345_v7  ;;  %v347_v11 = vld [vmem:[#allocation6 + $0x78] sm:$0xf0]  ;;  %v337_v14 = vld [vmem:[#allocation6 + $0x60] sm:$0xf]  ;;  %v365_v15 = vld [vmem:[#allocation6 + $0x64] sm:$0xf0] }
  0x11   :  { %81 = vadd.xlane.f32.xlu1 %v79_v1  ;;  %v350_v12 = vor.u32 %v366_v9, %v347_v11  ;;  %v364_v16 = vld [vmem:[#allocation6 + $0x64] sm:$0xf]  ;;  %v338_v17 = vor.u32 %v365_v15, %v337_v14  ;;  %v339_v18 = vld [vmem:[#allocation6 + $0x68] sm:$0xf0]  ;;  %v329_v21 = vld [vmem:[#allocation6 + $0x50] sm:$0xf] }
  0x12   :  { %231 = vmatpush.bf16.msra.mxu0 %v346_v10  ;;  %v342_v19 = vor.u32 %v364_v16, %v339_v18  ;;  %v363_v22 = vld [vmem:[#allocation6 + $0x54] sm:$0xf0]  ;;  %v362_v23 = vld [vmem:[#allocation6 + $0x54] sm:$0xf]  ;;  %v331_v25 = vld [vmem:[#allocation6 + $0x58] sm:$0xf0] }
  0x13   :  { %245 = vmatpush.bf16.msra.mxu1 %v350_v12  ;;  %v330_v24 = vor.u32 %v363_v22, %v329_v21  ;;  %v334_v26 = vor.u32 %v362_v23, %v331_v25  ;;  %v321_v28 = vld [vmem:[#allocation6 + $0x40] sm:$0xf]  ;;  %v361_v29 = vld [vmem:[#allocation6 + $0x44] sm:$0xf0]  ;;  %v360_v30 = vld [vmem:[#allocation6 + $0x44] sm:$0xf] }
  0x14   :  { %v322_v31 = vor.u32 %v361_v29, %v321_v28  ;;  %v323_v32 = vld [vmem:[#allocation6 + $0x48] sm:$0xf0]  ;;  %v313_v35 = vld [vmem:[#allocation6 + $0x30] sm:$0xf]  ;;  %v359_v36 = vld [vmem:[#allocation6 + $0x34] sm:$0xf0] }
  0x15   :  { %v383_v5 = vpop.eup %382  ;;  %v326_v33 = vor.u32 %v360_v30, %v323_v32  ;;  %v358_v37 = vld [vmem:[#allocation6 + $0x34] sm:$0xf]  ;;  %v314_v38 = vor.u32 %v359_v36, %v313_v35  ;;  %v315_v39 = vld [vmem:[#allocation6 + $0x38] sm:$0xf0]  ;;  %v305_v44 = vld [vmem:[#allocation6 + $0x20] sm:$0xf] }
  0x16   :  { %v71_v6 = vmul.f32 128.0, %v383_v5  ;;  %232 = vmatpush.bf16.msra.mxu0 %v338_v17  ;;  %vm75_vm0 = vweird.f32 %v383_v5  ;;  %v318_v41 = vor.u32 %v358_v37, %v315_v39  ;;  %v357_v45 = vld [vmem:[#allocation6 + $0x24] sm:$0xf0]  ;;  %v356_v46 = vld [vmem:[#allocation6 + $0x24] sm:$0xf]  ;;  %s267_s2 = sshll.u32 %s496_s0, 4  ;;  %s268_s2 = int_to_ptr.vmem [resolvable:$true] %s267_s2 }
  0x17   :  { %68 = vadd.xlane.f32.xlu0 %v533_v2  ;;  %246 = vmatpush.bf16.msra.mxu1 %v342_v19  ;;  %v306_v49 = vor.u32 %v357_v45, %v305_v44  ;;  %v307_v50 = vld [vmem:[#allocation6 + $0x28] sm:$0xf0]  ;;  %v297_v53 = vld [vmem:[#allocation6 + $0x10] sm:$0xf]  ;;  %v355_v54 = vld [vmem:[#allocation6 + $0x14] sm:$0xf0] }
  0x18   :  { %v72_v13 = vsub.f32 1.0, %v71_v6  ;;  %v310_v51 = vor.u32 %v356_v46, %v307_v50  ;;  %v354_v55 = vld [vmem:[#allocation6 + $0x14] sm:$0xf]  ;;  %v298_v57 = vor.u32 %v355_v54, %v297_v53  ;;  %v299_v58 = vld [vmem:[#allocation6 + $0x18] sm:$0xf0]  ;;  %s269_s30 = sshll.u32 %s551_s3, 4  ;;  %s270_s30 = int_to_ptr.hbm [resolvable:$true] %s269_s30 }
  0x19   :  { %83 = vadd.xlane.f32.xlu1 %v80_v3  ;;  %v289_v59 = vld [vmem:[#allocation6] sm:$0xf]  ;;  %v302_v61 = vor.u32 %v354_v55, %v299_v58  ;;  %v353_v62 = vld [vmem:[#allocation6 + $0x4] sm:$0xf0]  ;;  %v352_v63 = vld [vmem:[#allocation6 + $0x4] sm:$0xf] }
  0x1a   :  { %v73_v20 = vmul.f32 %v383_v5, %v72_v13  ;;  %233 = vmatpush.bf16.msra.mxu0 %v330_v24  ;;  %v291_v1 = vld [vmem:[#allocation6 + $0x8] sm:$0xf0]  ;;  %v290_v4 = vor.u32 %v353_v62, %v289_v59  ;;  %s497_s4 = smov 256   ;;  %s498_s5 = smov 16  }
  0x1b   :  { %247 = vmatpush.bf16.msra.mxu1 %v334_v26  ;;  %v294_v6 = vor.u32 %v352_v63, %v291_v1 }
  0x1c   :  { %v74_v27 = vadd.f32 %v383_v5, %v73_v20 }
  0x1e   :  { %234 = vmatpush.bf16.msra.mxu0 %v322_v31  ;;  %v76_v34 = vsel %vm75_vm0, %v383_v5, %v74_v27  ;;  %v139_v31 = vld [vmem:[#allocation8] sm:$0x3] }
  0x1f   :  { %248 = vmatpush.bf16.msra.mxu1 %v326_v33  ;;  %v141_v32 = vperm.slane %v139_v31, 0  ;;  %v142_v33 = vperm.slane %v139_v31, 1 }
  0x22   :  { %235 = vmatpush.bf16.msra.mxu0 %v314_v38 }
  0x23   :  { %249 = vmatpush.bf16.msra.mxu1 %v318_v41 }
  0x26   :  { %236 = vmatpush.bf16.msra.mxu0 %v306_v49 }
  0x27   :  { %250 = vmatpush.bf16.msra.mxu1 %v310_v51 }
  0x2a   :  { %237 = vmatpush.bf16.msra.mxu0 %v298_v57 }
  0x2b   :  { %251 = vmatpush.bf16.msra.mxu1 %v302_v61 }
  0x2e   :  { %238 = vmatpush.bf16.msra.mxu0 %v290_v4 }
  0x2f   :  { %252 = vmatpush.bf16.msra.mxu1 %v294_v6 }
  0x82   :  { %v67_v40 = vpop.xlane.xlu0 %66 }
  0x83   :  { %v538_v42 = vmul.f32 %v76_v34, %v67_v40 }
  0x84   :  { %v82_v43 = vpop.xlane.xlu1 %81 }
  0x85   :  { %v87_v47 = vmul.f32 %v538_v42, %v538_v42  ;;  %v85_v48 = vmul.f32 %v82_v43, %v76_v34  ;;  %v91_v24 = vsub.f32 %v528_v0, %v538_v42 }
  0x87   :  { %v89_v52 = vsub.f32 %v85_v48, %v87_v47 }
  0x89   :  { %v93_v56 = vadd.f32 1e-05, %v89_v52 }
  0x8a   :  { %v69_v60 = vpop.xlane.xlu0 %68 }
  0x8b   :  { %384 = vrsqrt.f32 %v93_v56  ;;  %v78_v3 = vmul.f32 %v76_v34, %v69_v60  ;;  %vm101_vm2 = vweird.f32 %v93_v56 }
  0x8c   :  { %v84_v5 = vpop.xlane.xlu1 %83 }
  0x8d   :  { %v88_v7 = vmul.f32 %v78_v3, %v78_v3  ;;  %v86_v8 = vmul.f32 %v84_v5, %v76_v34  ;;  %v92_v25 = vsub.f32 %v533_v2, %v78_v3 }
  0x8f   :  { %v90_v9 = vsub.f32 %v86_v8, %v88_v7 }
  0x91   :  { %v385_v10 = vpop.eup %384  ;;  %v94_v11 = vadd.f32 1e-05, %v90_v9 }
  0x92   :  { %v96_v12 = vmul.f32 %v385_v10, %v93_v56  ;;  %vm102_vm1 = vweird.f32 %v385_v10 }
  0x93   :  { %386 = vrsqrt.f32 %v94_v11  ;;  %vm103_vm4 = vmor %vm101_vm2, %vm102_vm1  ;;  %vm111_vm5 = vweird.f32 %v94_v11 }
  0x94   :  { %v97_v13 = vmul.f32 %v385_v10, %v96_v12 }
  0x96   :  { %v98_v14 = vmul.f32 0.5, %v97_v13 }
  0x98   :  { %v99_v16 = vsub.f32 1.5, %v98_v14 }
  0x99   :  { %v387_v15 = vpop.eup %386 }
  0x9a   :  { %v106_v17 = vmul.f32 %v387_v15, %v94_v11  ;;  %v100_v19 = vmul.f32 %v385_v10, %v99_v16  ;;  %vm112_vm3 = vweird.f32 %v387_v15 }
  0x9b   :  { %vm113_vm6 = vmor %vm111_vm5, %vm112_vm3 }
  0x9c   :  { %v107_v18 = vmul.f32 %v387_v15, %v106_v17  ;;  %v104_v22 = vsel %vm103_vm4, %v385_v10, %v100_v19 }
  0x9d   :  { %v115_v27 = vmul.f32 %v104_v22, %v91_v24 }
  0x9e   :  { %v108_v20 = vmul.f32 0.5, %v107_v18 }
  0xa0   :  { %v109_v21 = vsub.f32 1.5, %v108_v20 }
  0xa2   :  { %v110_v23 = vmul.f32 %v387_v15, %v109_v21 }
  0xa4   :  { %v114_v26 = vsel %vm113_vm6, %v387_v15, %v110_v23 }
  0xa5   :  { %v116_v28 = vmul.f32 %v114_v26, %v92_v25 }
  0xa7   :  { %v371_v29 = vpack.c.bf16 %v116_v28, %v115_v27 }
  0xa9   :  { %372 = vst [vmem:[#allocation2] sm:$0xff] %v371_v29  }
  0xb0   :  { %v351_v30 = vld [vmem:[#allocation2] sm:$0xff] }
  0xb1   :  { %239 = vmatmul.bf16.vlgmr.msra.gmra.mxu0 %v351_v30  ;;  %253 = vmatmul.bf16.vlgmr.msra.gmra.mxu1 %v351_v30 }
 0x12e   :  { %v240_v34 = vpop.f32.mrf.mxu0  ;;  %v254_v35 = vpop.f32.mrf.mxu1 }
 0x12f   :  { %v241_v36 = vadd.f32 %v240_v34, %v141_v32  ;;  %v255_v37 = vadd.f32 %v254_v35, %v142_v33 }
 0x131   :  { %259 = vst [vmem:[#allocation9] sm:$0xff] %v241_v36 }
 0x132   :  { %260 = vst [vmem:[#allocation9 + $0x8] sm:$0xff] %v255_v37 }
 0x136   :  { %v242_v0 = vpop.f32.mrf.mxu0  ;;  %v256_v2 = vpop.f32.mrf.mxu1 }
 0x137   :  { %v243_v38 = vadd.f32 %v242_v0, %v141_v32  ;;  %v257_v39 = vadd.f32 %v256_v2, %v142_v33 }
 0x139   :  { %261 = vst [vmem:[#allocation9 + $0x10] sm:$0xff] %v243_v38 }
 0x13a   :  { %262 = vst [vmem:[#allocation9 + $0x18] sm:$0xff] %v257_v39 }
 0x13b   :  { %275 = dma.vmem_to_hbm [thread:$0]  %s268_s2, 512, %s270_s30, [#allocation5], %s497_s4, %s497_s4, %s498_s5  }
 0x13c   :  { %488 = dma.done.wait [#allocation5], 512  }
 0x13d   :  { %489 = vsyncadd [#allocation5], 4294966784 }
 0x13e   :  { %280 = vsyncpa [#allocation4], 1 }
 0x13f   :  { %281 = vsyncpa [#allocation7], 1 }
 0x140   :  { %282 = vsyncpa [#allocation5], 1 }

</bundles_post_ra>
